<compile_context>
chip_gen: v7x
topology: tpu7x:2x2x1
jax: 0.10.0
libtpu: 0.0.40
codegen_flags: <defaults>
</compile_context>

<pallas_src>
import functools

import jax
import jax.numpy as jnp
from jax.experimental import pallas as pl
from jax.experimental.pallas import tpu as pltpu


def _round_up(x, m):
    return ((x + m - 1) // m) * m


# ----------------------------- Pallas kernel ------------------------------ #
def _fused_enc_dec_kernel(x_ref, w1t_ref, b1_ref, w2t_ref, b2_ref, o_ref,
                          *, shifts, num_anchors):
    """Fused 3x3 conv -> bias -> ReLU -> 1x1 conv -> bias (transposed layout).

    x_ref  : (1, Cin, L)       bf16  padded image, spatial axis flattened
    w1t_ref: (KH*KW, C1, Cin)  bf16  encoder taps (transposed per tap)
    b1_ref : (C1, 1)           f32
    w2t_ref: (C2, C1)          bf16  decoder weight (transposed)
    b2_ref : (C2, 1)           f32
    o_ref  : (1, C2, A)        f32   channel-major output (A = lane axis)
    """
    x = x_ref[0]                                        # (Cin, L) bf16
    c1 = w1t_ref.shape[1]
    acc = jnp.zeros((c1, num_anchors), jnp.float32)
    # 3x3 conv as 9 statically shifted matmul-accumulates; the "im2col" never
    # leaves VMEM/vregs.
    for k, s in enumerate(shifts):
        acc = acc + jnp.dot(w1t_ref[k], x[:, s:s + num_anchors],
                            preferred_element_type=jnp.float32)
    h = jnp.maximum(acc + b1_ref[...], 0.0)             # (C1, A) f32
    # decoder 1x1 conv (tiny K=C1 matmul) + bias
    y = jnp.dot(w2t_ref[...], h.astype(w2t_ref.dtype),
                preferred_element_type=jnp.float32) + b2_ref[...]
    o_ref[0] = y.astype(o_ref.dtype)


# ------------------------------ JAX wrapper -------------------------------- #
def fused_encoder_decoder(x_nchw, w1_4d, b1, w2, b2):
    N, Cin, H, W = x_nchw.shape
    KH, KW, _, C1 = w1_4d.shape
    C2 = w2.shape[1]
    Hp, Wp = H + KH - 1, W + KW - 1                 # SAME padding, stride 1

    # Lane axis ("anchors") = flattened padded-row positions; round up to a
    # multiple of 128 so every store is an unmasked, full-width vst.
    A = _round_up(H * Wp, 128)
    max_shift = (KH - 1) * Wp + (KW - 1)
    L = A + max_shift                               # always >= Hp*Wp
    shifts = tuple(kh * Wp + kw for kh in range(KH) for kw in range(KW))

    # Pad spatially (zeros), flatten spatial dims, pad the flat axis so every
    # shifted slice of length A stays in bounds. bf16 activations.
    xp = jnp.pad(x_nchw.astype(jnp.bfloat16), ((0, 0), (0, 0), (1, 1), (1, 1)))
    xflat = xp.reshape(N, Cin, Hp * Wp)
    xflat = jnp.pad(xflat, ((0, 0), (0, 0), (0, L - Hp * Wp)))

    # Transposed weights / biases.
    w1t = jnp.transpose(w1_4d, (0, 1, 3, 2)).reshape(KH * KW, C1, Cin)
    w1t = w1t.astype(jnp.bfloat16)                  # (9, C1, Cin)
    w2t = w2.T.astype(jnp.bfloat16)                 # (C2, C1)
    b1c = b1.reshape(C1, 1).astype(jnp.float32)
    b2c = b2.reshape(C2, 1).astype(jnp.float32)

    kernel = functools.partial(_fused_enc_dec_kernel,
                               shifts=shifts, num_anchors=A)

    y_anchor = pl.pallas_call(
        kernel,
        out_shape=jax.ShapeDtypeStruct((N, C2, A), jnp.float32),
        grid_spec=pltpu.PrefetchScalarGridSpec(
            num_scalar_prefetch=0,
            grid=(N,),                              # >=2 parallel steps -> both v7x TCs busy
            in_specs=[
                pl.BlockSpec((1, Cin, L), lambda n: (n, 0, 0)),          # image
                pl.BlockSpec((KH * KW, C1, Cin), lambda n: (0, 0, 0)),   # enc W
                pl.BlockSpec((C1, 1), lambda n: (0, 0)),                 # enc b
                pl.BlockSpec((C2, C1), lambda n: (0, 0)),                # dec W
                pl.BlockSpec((C2, 1), lambda n: (0, 0)),                 # dec b
            ],
            out_specs=pl.BlockSpec((1, C2, A), lambda n: (n, 0, 0)),
        ),
        compiler_params=pltpu.CompilerParams(
            dimension_semantics=("parallel",),
        ),
    )(xflat, w1t, b1c, w2t, b2c)

    # Channel-major anchors -> NCHW via cheap slice/reshape (no transpose).
    y = y_anchor[:, :, :H * Wp].reshape(N, C2, H, Wp)[:, :, :, :W]
    return y


def model_base_forward(x_nchw, params):
    """Forward pass of the (instantiated) ModelBase; returns a dict like the
    PyTorch module's forward."""
    y = fused_encoder_decoder(x_nchw, params["w1"], params["b1"],
                              params["w2"], params["b2"])
    return {"out": y}


def init_params(key, cin=4, cenc=8, cout=4, k=3):
    k1, k2, k3, k4 = jax.random.split(key, 4)
    w1 = jax.random.normal(k1, (k, k, cin, cenc), jnp.float32) * 0.1
    b1 = jax.random.normal(k2, (cenc,), jnp.float32) * 0.1
    w2 = jax.random.normal(k3, (cenc, cout), jnp.float32) * 0.1
    b2 = jax.random.normal(k4, (cout,), jnp.float32) * 0.1
    return {"w1": w1, "b1": b1, "w2": w2, "b2": b2}


def _reference_forward(x_nchw, params):
    """Pure-JAX reference (lax conv) for correctness checking."""
    w1 = params["w1"]                        # (KH, KW, Cin, Cenc)
    b1 = params["b1"].reshape(1, -1, 1, 1)
    w2 = params["w2"]                        # (Cenc, Cout)
    b2 = params["b2"].reshape(1, -1, 1, 1)

    h = jax.lax.conv_general_dilated(
        x_nchw, w1, window_strides=(1, 1), padding="SAME",
        dimension_numbers=("NCHW", "HWIO", "NCHW"))
    h = jnp.maximum(h + b1, 0.0)
    y = jnp.einsum("nchw,cd->ndhw", h, w2) + b2
    return {"out": y}


if __name__ == "__main__":
    key = jax.random.PRNGKey(0)
    kx, kp = jax.random.split(key)

    # small shapes consistent with the module: batch=2, channels=4, spatial=16
    x = jax.random.normal(kx, (2, 4, 16, 16), jnp.float32)
    params = init_params(kp)

    fwd = jax.jit(model_base_forward)
    out = fwd(x, params)
    jax.block_until_ready(out["out"])

    ref = _reference_forward(x, params)
    assert out["out"].shape == (2, 4, 16, 16)
    # bf16 activations/weights with f32 accumulation -> loose-ish tolerance.
    assert jnp.allclose(out["out"], ref["out"], atol=2e-2, rtol=2e-2), \
        "mismatch vs reference"

    print("KERNEL_OK")
</pallas_src>

<mosaic_0001>
module attributes {stable_mosaic.version = 11 : i64} {
  func.func @_fused_enc_dec_kernel(%arg0: i32, %arg1: memref<1x4x422xbf16, #tpu.memory_space<vmem>>, %arg2: memref<9x8x4xbf16, #tpu.memory_space<vmem>>, %arg3: memref<8x1xf32, #tpu.memory_space<vmem>>, %arg4: memref<4x8xbf16, #tpu.memory_space<vmem>>, %arg5: memref<4x1xf32, #tpu.memory_space<vmem>>, %arg6: memref<1x4x384xf32, #tpu.memory_space<vmem>>) attributes {dimension_semantics = [#tpu.dimension_semantics<parallel>], iteration_bounds = array<i64: 2>, scalar_prefetch = 0 : i64, scratch_operands = 0 : i64, tpu.core_type = #tpu.core_type<tc>, window_params = [{transform_indices = @transform_0, window_bounds = array<i64: 1, 4, 422>}, {pipeline_mode = #tpu.pipeline_mode<synchronous>, transform_indices = @transform_1, window_bounds = array<i64: 9, 8, 4>}, {pipeline_mode = #tpu.pipeline_mode<synchronous>, transform_indices = @transform_2, window_bounds = array<i64: 8, 1>}, {pipeline_mode = #tpu.pipeline_mode<synchronous>, transform_indices = @transform_3, window_bounds = array<i64: 4, 8>}, {pipeline_mode = #tpu.pipeline_mode<synchronous>, transform_indices = @transform_4, window_bounds = array<i64: 4, 1>}, {transform_indices = @transform_5, window_bounds = array<i64: 1, 4, 384>}]} {
    %c0 = arith.constant 0 : index
    %c0_0 = arith.constant 0 : index
    %c0_1 = arith.constant 0 : index
    %0 = vector.load %arg1[%c0, %c0_0, %c0_1] : memref<1x4x422xbf16, #tpu.memory_space<vmem>>, vector<1x4x422xbf16>
    %1 = vector.shape_cast %0 : vector<1x4x422xbf16> to vector<4x422xbf16>
    %cst = arith.constant 0.000000e+00 : f32
    %2 = vector.broadcast %cst : f32 to vector<8x384xf32>
    %c0_2 = arith.constant 0 : index
    %c0_3 = arith.constant 0 : index
    %c0_4 = arith.constant 0 : index
    %3 = vector.load %arg2[%c0_2, %c0_3, %c0_4] : memref<9x8x4xbf16, #tpu.memory_space<vmem>>, vector<1x8x4xbf16>
    %4 = vector.shape_cast %3 : vector<1x8x4xbf16> to vector<8x4xbf16>
    %5 = vector.extract_strided_slice %1 {offsets = [0, 0], sizes = [4, 384], strides = [1, 1]} : vector<4x422xbf16> to vector<4x384xbf16>
    %cst_5 = arith.constant dense<0.000000e+00> : vector<8x384xf32>
    %6 = tpu.matmul %4, %5, %cst_5 {dimension_numbers = #tpu.dot_dimension_numbers<[1], [0], [0], [1], [0, 0, 1, 1], [], []>} : vector<8x4xbf16>, vector<4x384xbf16>, vector<8x384xf32> -> vector<8x384xf32>
    %7 = arith.addf %2, %6 : vector<8x384xf32>
    %c1 = arith.constant 1 : index
    %c0_6 = arith.constant 0 : index
    %c0_7 = arith.constant 0 : index
    %8 = vector.load %arg2[%c1, %c0_6, %c0_7] : memref<9x8x4xbf16, #tpu.memory_space<vmem>>, vector<1x8x4xbf16>
    %9 = vector.shape_cast %8 : vector<1x8x4xbf16> to vector<8x4xbf16>
    %10 = vector.extract_strided_slice %1 {offsets = [0, 1], sizes = [4, 384], strides = [1, 1]} : vector<4x422xbf16> to vector<4x384xbf16>
    %cst_8 = arith.constant dense<0.000000e+00> : vector<8x384xf32>
    %11 = tpu.matmul %9, %10, %cst_8 {dimension_numbers = #tpu.dot_dimension_numbers<[1], [0], [0], [1], [0, 0, 1, 1], [], []>} : vector<8x4xbf16>, vector<4x384xbf16>, vector<8x384xf32> -> vector<8x384xf32>
    %12 = arith.addf %7, %11 : vector<8x384xf32>
    %c2 = arith.constant 2 : index
    %c0_9 = arith.constant 0 : index
    %c0_10 = arith.constant 0 : index
    %13 = vector.load %arg2[%c2, %c0_9, %c0_10] : memref<9x8x4xbf16, #tpu.memory_space<vmem>>, vector<1x8x4xbf16>
    %14 = vector.shape_cast %13 : vector<1x8x4xbf16> to vector<8x4xbf16>
    %15 = vector.extract_strided_slice %1 {offsets = [0, 2], sizes = [4, 384], strides = [1, 1]} : vector<4x422xbf16> to vector<4x384xbf16>
    %cst_11 = arith.constant dense<0.000000e+00> : vector<8x384xf32>
    %16 = tpu.matmul %14, %15, %cst_11 {dimension_numbers = #tpu.dot_dimension_numbers<[1], [0], [0], [1], [0, 0, 1, 1], [], []>} : vector<8x4xbf16>, vector<4x384xbf16>, vector<8x384xf32> -> vector<8x384xf32>
    %17 = arith.addf %12, %16 : vector<8x384xf32>
    %c3 = arith.constant 3 : index
    %c0_12 = arith.constant 0 : index
    %c0_13 = arith.constant 0 : index
    %18 = vector.load %arg2[%c3, %c0_12, %c0_13] : memref<9x8x4xbf16, #tpu.memory_space<vmem>>, vector<1x8x4xbf16>
    %19 = vector.shape_cast %18 : vector<1x8x4xbf16> to vector<8x4xbf16>
    %20 = vector.extract_strided_slice %1 {offsets = [0, 18], sizes = [4, 384], strides = [1, 1]} : vector<4x422xbf16> to vector<4x384xbf16>
    %cst_14 = arith.constant dense<0.000000e+00> : vector<8x384xf32>
    %21 = tpu.matmul %19, %20, %cst_14 {dimension_numbers = #tpu.dot_dimension_numbers<[1], [0], [0], [1], [0, 0, 1, 1], [], []>} : vector<8x4xbf16>, vector<4x384xbf16>, vector<8x384xf32> -> vector<8x384xf32>
    %22 = arith.addf %17, %21 : vector<8x384xf32>
    %c4 = arith.constant 4 : index
    %c0_15 = arith.constant 0 : index
    %c0_16 = arith.constant 0 : index
    %23 = vector.load %arg2[%c4, %c0_15, %c0_16] : memref<9x8x4xbf16, #tpu.memory_space<vmem>>, vector<1x8x4xbf16>
    %24 = vector.shape_cast %23 : vector<1x8x4xbf16> to vector<8x4xbf16>
    %25 = vector.extract_strided_slice %1 {offsets = [0, 19], sizes = [4, 384], strides = [1, 1]} : vector<4x422xbf16> to vector<4x384xbf16>
    %cst_17 = arith.constant dense<0.000000e+00> : vector<8x384xf32>
    %26 = tpu.matmul %24, %25, %cst_17 {dimension_numbers = #tpu.dot_dimension_numbers<[1], [0], [0], [1], [0, 0, 1, 1], [], []>} : vector<8x4xbf16>, vector<4x384xbf16>, vector<8x384xf32> -> vector<8x384xf32>
    %27 = arith.addf %22, %26 : vector<8x384xf32>
    %c5 = arith.constant 5 : index
    %c0_18 = arith.constant 0 : index
    %c0_19 = arith.constant 0 : index
    %28 = vector.load %arg2[%c5, %c0_18, %c0_19] : memref<9x8x4xbf16, #tpu.memory_space<vmem>>, vector<1x8x4xbf16>
    %29 = vector.shape_cast %28 : vector<1x8x4xbf16> to vector<8x4xbf16>
    %30 = vector.extract_strided_slice %1 {offsets = [0, 20], sizes = [4, 384], strides = [1, 1]} : vector<4x422xbf16> to vector<4x384xbf16>
    %cst_20 = arith.constant dense<0.000000e+00> : vector<8x384xf32>
    %31 = tpu.matmul %29, %30, %cst_20 {dimension_numbers = #tpu.dot_dimension_numbers<[1], [0], [0], [1], [0, 0, 1, 1], [], []>} : vector<8x4xbf16>, vector<4x384xbf16>, vector<8x384xf32> -> vector<8x384xf32>
    %32 = arith.addf %27, %31 : vector<8x384xf32>
    %c6 = arith.constant 6 : index
    %c0_21 = arith.constant 0 : index
    %c0_22 = arith.constant 0 : index
    %33 = vector.load %arg2[%c6, %c0_21, %c0_22] : memref<9x8x4xbf16, #tpu.memory_space<vmem>>, vector<1x8x4xbf16>
    %34 = vector.shape_cast %33 : vector<1x8x4xbf16> to vector<8x4xbf16>
    %35 = vector.extract_strided_slice %1 {offsets = [0, 36], sizes = [4, 384], strides = [1, 1]} : vector<4x422xbf16> to vector<4x384xbf16>
    %cst_23 = arith.constant dense<0.000000e+00> : vector<8x384xf32>
    %36 = tpu.matmul %34, %35, %cst_23 {dimension_numbers = #tpu.dot_dimension_numbers<[1], [0], [0], [1], [0, 0, 1, 1], [], []>} : vector<8x4xbf16>, vector<4x384xbf16>, vector<8x384xf32> -> vector<8x384xf32>
    %37 = arith.addf %32, %36 : vector<8x384xf32>
    %c7 = arith.constant 7 : index
    %c0_24 = arith.constant 0 : index
    %c0_25 = arith.constant 0 : index
    %38 = vector.load %arg2[%c7, %c0_24, %c0_25] : memref<9x8x4xbf16, #tpu.memory_space<vmem>>, vector<1x8x4xbf16>
    %39 = vector.shape_cast %38 : vector<1x8x4xbf16> to vector<8x4xbf16>
    %40 = vector.extract_strided_slice %1 {offsets = [0, 37], sizes = [4, 384], strides = [1, 1]} : vector<4x422xbf16> to vector<4x384xbf16>
    %cst_26 = arith.constant dense<0.000000e+00> : vector<8x384xf32>
    %41 = tpu.matmul %39, %40, %cst_26 {dimension_numbers = #tpu.dot_dimension_numbers<[1], [0], [0], [1], [0, 0, 1, 1], [], []>} : vector<8x4xbf16>, vector<4x384xbf16>, vector<8x384xf32> -> vector<8x384xf32>
    %42 = arith.addf %37, %41 : vector<8x384xf32>
    %c8 = arith.constant 8 : index
    %c0_27 = arith.constant 0 : index
    %c0_28 = arith.constant 0 : index
    %43 = vector.load %arg2[%c8, %c0_27, %c0_28] : memref<9x8x4xbf16, #tpu.memory_space<vmem>>, vector<1x8x4xbf16>
    %44 = vector.shape_cast %43 : vector<1x8x4xbf16> to vector<8x4xbf16>
    %45 = vector.extract_strided_slice %1 {offsets = [0, 38], sizes = [4, 384], strides = [1, 1]} : vector<4x422xbf16> to vector<4x384xbf16>
    %cst_29 = arith.constant dense<0.000000e+00> : vector<8x384xf32>
    %46 = tpu.matmul %44, %45, %cst_29 {dimension_numbers = #tpu.dot_dimension_numbers<[1], [0], [0], [1], [0, 0, 1, 1], [], []>} : vector<8x4xbf16>, vector<4x384xbf16>, vector<8x384xf32> -> vector<8x384xf32>
    %47 = arith.addf %42, %46 : vector<8x384xf32>
    %c0_30 = arith.constant 0 : index
    %c0_31 = arith.constant 0 : index
    %48 = vector.load %arg3[%c0_30, %c0_31] : memref<8x1xf32, #tpu.memory_space<vmem>>, vector<8x1xf32>
    %49 = vector.broadcast %48 : vector<8x1xf32> to vector<8x384xf32>
    %50 = arith.addf %47, %49 : vector<8x384xf32>
    %cst_32 = arith.constant 0.000000e+00 : f32
    %51 = vector.broadcast %cst_32 : f32 to vector<8x384xf32>
    %52 = arith.maximumf %50, %51 : vector<8x384xf32>
    %c0_33 = arith.constant 0 : index
    %c0_34 = arith.constant 0 : index
    %53 = vector.load %arg4[%c0_33, %c0_34] : memref<4x8xbf16, #tpu.memory_space<vmem>>, vector<4x8xbf16>
    %54 = arith.truncf %52 : vector<8x384xf32> to vector<8x384xbf16>
    %cst_35 = arith.constant dense<0.000000e+00> : vector<4x384xf32>
    %55 = tpu.matmul %53, %54, %cst_35 {dimension_numbers = #tpu.dot_dimension_numbers<[1], [0], [0], [1], [0, 0, 1, 1], [], []>} : vector<4x8xbf16>, vector<8x384xbf16>, vector<4x384xf32> -> vector<4x384xf32>
    %c0_36 = arith.constant 0 : index
    %c0_37 = arith.constant 0 : index
    %56 = vector.load %arg5[%c0_36, %c0_37] : memref<4x1xf32, #tpu.memory_space<vmem>>, vector<4x1xf32>
    %57 = vector.broadcast %56 : vector<4x1xf32> to vector<4x384xf32>
    %58 = arith.addf %55, %57 : vector<4x384xf32>
    %c0_38 = arith.constant 0 : index
    %c0_39 = arith.constant 0 : index
    %c0_40 = arith.constant 0 : index
    %59 = vector.load %arg6[%c0_38, %c0_39, %c0_40] : memref<1x4x384xf32, #tpu.memory_space<vmem>>, vector<1x4x384xf32>
    %60 = vector.shape_cast %59 : vector<1x4x384xf32> to vector<4x384xf32>
    %61 = vector.shape_cast %58 : vector<4x384xf32> to vector<1x4x384xf32>
    tpu.vector_store %arg6[%c0_38, %c0_39, %c0_40], %61 {strides = array<i32>} : memref<1x4x384xf32, #tpu.memory_space<vmem>>, vector<1x4x384xf32>,
    return
  }
  func.func @transform_0(%arg0: i32) -> (i32, i32, i32) {
    %c0_i32 = arith.constant 0 : i32
    %c0_i32_0 = arith.constant 0 : i32
    %c0_i32_1 = arith.constant 0 : i32
    return %arg0, %c0_i32, %c0_i32_0 : i32, i32, i32
  }
  func.func @transform_1(%arg0: i32) -> (i32, i32, i32) {
    %c0_i32 = arith.constant 0 : i32
    %c0_i32_0 = arith.constant 0 : i32
    %c0_i32_1 = arith.constant 0 : i32
    %c0_i32_2 = arith.constant 0 : i32
    return %c0_i32, %c0_i32_0, %c0_i32_1 : i32, i32, i32
  }
  func.func @transform_2(%arg0: i32) -> (i32, i32) {
    %c0_i32 = arith.constant 0 : i32
    %c0_i32_0 = arith.constant 0 : i32
    %c0_i32_1 = arith.constant 0 : i32
    return %c0_i32, %c0_i32_0 : i32, i32
  }
  func.func @transform_3(%arg0: i32) -> (i32, i32) {
    %c0_i32 = arith.constant 0 : i32
    %c0_i32_0 = arith.constant 0 : i32
    %c0_i32_1 = arith.constant 0 : i32
    return %c0_i32, %c0_i32_0 : i32, i32
  }
  func.func @transform_4(%arg0: i32) -> (i32, i32) {
    %c0_i32 = arith.constant 0 : i32
    %c0_i32_0 = arith.constant 0 : i32
    %c0_i32_1 = arith.constant 0 : i32
    return %c0_i32, %c0_i32_0 : i32, i32
  }
  func.func @transform_5(%arg0: i32) -> (i32, i32, i32) {
    %c0_i32 = arith.constant 0 : i32
    %c0_i32_0 = arith.constant 0 : i32
    %c0_i32_1 = arith.constant 0 : i32
    return %arg0, %c0_i32, %c0_i32_0 : i32, i32, i32
  }
}

</mosaic_0001>

<bundles_post_ra>
// kernel: model_base_forward.1
= control target key start
LH: loop header
LB: loop body
LE: loop exit
PB: predicated region body
PF: predicated region fallthrough
CT: control target
= control target key end

     0   :  { %s1599_s18 = smov 0   ;;  %s1769_s0 = inlined_call_operand.vmem [shape: bf16[2,4,422], index: 0, kind: input, shape index: {}]   ;;  %s1770_s1 = inlined_call_operand.vmem [shape: bf16[9,8,4], index: 1, kind: input, shape index: {}]   ;;  %s1771_s2 = inlined_call_operand.vmem [shape: f32[8,1], index: 2, kind: input, shape index: {}]   ;;  %s1772_s3 = inlined_call_operand.vmem [shape: bf16[4,8], index: 3, kind: input, shape index: {}]   ;;  %s1773_s4 = inlined_call_operand.vmem [shape: f32[4,1], index: 4, kind: input, shape index: {}]   ;;  %s1774_s5 = inlined_call_operand.vmem [shape: f32[2,4,384], index: 5, kind: output, shape index: {}]  }
   0x1 LB: > { %s1396_s19 = sadd.s32 4294967295, %s1555_s18   ;;  %p1400_p0 = scmp.ge.s32.totalorder %s1555_s18, 1  ;;  %s1555_s18 = sphi %s1599_s18, %s15_s18  }
   0x2   : > { %p187_p1 = scmp.lt.s32.totalorder %s1555_s18, 3 }
   0x4   : > { %p188_p2 = pnand %p1400_p0, %p187_p1 }
   0x5   : > { %p215_p3 = scmp.lt.s32.totalorder (!%p188_p2), %s1396_s19, 1  ;;  %v235_v0 = vlaneseq (!%p188_p2)  ;;  %v1557_v1 = vmov (!%p188_p2), 1983009808   ;;  %v1558_v5 = vmov (!%p188_p2), 0.0   ;;  %v1559_v6 = vmov (!%p188_p2), 0   ;;  %s1561_s24 = smov (!%p188_p2), 127  }
   0x6   : > { %191 = sbr.rel (%p188_p2) target bundleno = 650 (0x28a), region = 40  ;;  %v233_v2 = vunpack.c.l.s4 (!%p188_p2), %v1557_v1  ;;  %1465 = vmatprep.subr.bf16.mxu1 (!%p188_p2), %v1558_v5  ;;  %306 = vmatprep.mubr.bf16.mxu0 (!%p188_p2), %v1559_v6  ;;  %vm1560_vm0 = vmmov (!%p188_p2), 0   ;;  %s1562_s25 = smov (!%p188_p2), 126   ;;  %v1218_v14 = vld [vmem:[%s1771_s2] sm:$0xff] (!%p188_p2)  ;;  %vm256_vm1 = vcmask (!%p188_p2), 1039360   ;;  %vm264_vm2 = vcmask (!%p188_p2), 1041408  }
   0x7   : > { %v236_v3 = vshrl.u32 (!%p188_p2), %v235_v0, 7  ;;  %1546 = vset.pattern.permute.xlu0 (!%p188_p2), %v1559_v6  ;;  %1547 = vset.pattern.permute.xlu1 (!%p188_p2), %v1559_v6  ;;  %s1563_s26 = smov (!%p188_p2), 110   ;;  %s1564_s27 = smov (!%p188_p2), 109   ;;  %v1404_v23 = vld [vmem:[%s1770_s1 + $0x4] sm:$0xf] (!%p188_p2)  ;;  %vm260_vm3 = vcmask (!%p188_p2), 31744  }
   0x8   : > { %v234_v4 = vunpack.c.0.s8 (!%p188_p2), %v233_v2  ;;  %1467 = vmatprep.mubr.msk.bf16.mxu1 (!%p188_p2), %vm1560_vm0, %v1558_v5  ;;  %s1565_s28 = smov (!%p188_p2), 108   ;;  %s1566_s29 = smov (!%p188_p2), 92   ;;  %vm458_vm4 = vcmask (!%p188_p2), 1031168   ;;  %v227_v33 = vld [vmem:[%s1770_s1] sm:$0xf] (!%p188_p2)  ;;  %vm568_vm5 = vcmask (!%p188_p2), 900096  }
   0x9   : > { %s1567_s30 = smov (!%p188_p2), 91   ;;  %s1568_s6 = smov (!%p188_p2), 90   ;;  %v1411_v43 = vld [vmem:[%s1770_s1 + $0x8] sm:$0xf] (!%p188_p2)  ;;  %vm678_vm6 = vcmask (!%p188_p2), 891904   ;;  %vm788_vm7 = vcmask (!%p188_p2), 883712  }
   0xa   : > { %v237_v7 = vsub.s32 (!%p188_p2), %v234_v4, %v236_v3  ;;  %v1415_v53 = vld [vmem:[%s1770_s1 + $0xc] sm:$0xf] (!%p188_p2)  ;;  %v1419_v63 = vld [vmem:[%s1770_s1 + $0x10] sm:$0xf] (!%p188_p2)  ;;  %vm898_vm8 = vcmask (!%p188_p2), 752640   ;;  %vm1008_vm9 = vcmask (!%p188_p2), 744448  }
   0xb   : > { %vm1118_vm10 = vcmask (!%p188_p2), 736256   ;;  %vm1244_vm11 = vcmask (!%p188_p2), 1043456   ;;  %vm1240_vm12 = vcmask (!%p188_p2), 64512  }
   0xd   : > { %s1776_s19 = smov (!%p215_p3, %s1396_s19), 1 }
   0xe   : > { %s1444_s20 = sshll.u32 %s1776_s19, 3  ;;  %s1525_s8 = smul.u32 12, %s1776_s19 }
   0xf   : > { %s219_s23 = scalar_lea.vmem %s1769_s0, %s1444_s20 }
  0x10   : > { %v226_v8 = vld [vmem:[%s219_s23] sm:$0xff]  ;;  %s224_s11 = scalar_lea.vmem %s1774_s5, %s1525_s8 }
  0x11   : > { %v1619_v9 = vrot.slane %v226_v8, %v237_v7  ;;  %v231_v10 = vcombine.high %v226_v8, %v226_v8 }
  0x13   : > { %248 = vrot.lane.b32.xlu0 %v1619_v9, %s1561_s24  ;;  %v1622_v11 = vrot.slane %v231_v10, %v237_v7  ;;  %v246_v12 = vcombine.high %v1619_v9, %v1619_v9  ;;  %v359_v26 = vsel %vm264_vm2, %v1619_v9, 0 }
  0x15   : > { %252 = vrot.lane.b32.xlu1 %v1622_v11, %s1561_s24  ;;  %v247_v13 = vcombine.high %v1622_v11, %v1622_v11  ;;  %v365_v28 = vsel %vm264_vm2, %v1622_v11, 0 }
  0x17   : > { %250 = vrot.lane.b32.xlu0 %v246_v12, %s1561_s24 }
  0x19   : > { %254 = vrot.lane.b32.xlu1 %v247_v13, %s1561_s24 }
  0x1b   : > { %450 = vrot.lane.b32.xlu0 %v1619_v9, %s1562_s25 }
  0x1d   : > { %452 = vrot.lane.b32.xlu1 %v246_v12, %s1562_s25 }
  0x1f   : > { %454 = vrot.lane.b32.xlu0 %v1622_v11, %s1562_s25 }
  0x21   : > { %456 = vrot.lane.b32.xlu1 %v247_v13, %s1562_s25 }
  0x23   : > { %560 = vrot.lane.b32.xlu0 %v1619_v9, %s1563_s26 }
  0x25   : > { %562 = vrot.lane.b32.xlu1 %v246_v12, %s1563_s26 }
  0x27   : > { %564 = vrot.lane.b32.xlu0 %v1622_v11, %s1563_s26 }
  0x29   : > { %566 = vrot.lane.b32.xlu1 %v247_v13, %s1563_s26 }
  0x2b   : > { %670 = vrot.lane.b32.xlu0 %v1619_v9, %s1564_s27 }
  0x2d   : > { %672 = vrot.lane.b32.xlu1 %v246_v12, %s1564_s27 }
  0x2f   : > { %674 = vrot.lane.b32.xlu0 %v1622_v11, %s1564_s27 }
  0x31   : > { %676 = vrot.lane.b32.xlu1 %v247_v13, %s1564_s27 }
  0x33   : > { %780 = vrot.lane.b32.xlu0 %v1619_v9, %s1565_s28 }
  0x35   : > { %782 = vrot.lane.b32.xlu1 %v246_v12, %s1565_s28 }
  0x37   : > { %784 = vrot.lane.b32.xlu0 %v1622_v11, %s1565_s28 }
  0x39   : > { %786 = vrot.lane.b32.xlu1 %v247_v13, %s1565_s28 }
  0x3b   : > { %890 = vrot.lane.b32.xlu0 %v1619_v9, %s1566_s29 }
  0x3d   : > { %892 = vrot.lane.b32.xlu1 %v246_v12, %s1566_s29 }
  0x3f   : > { %894 = vrot.lane.b32.xlu0 %v1622_v11, %s1566_s29 }
  0x41   : > { %896 = vrot.lane.b32.xlu1 %v247_v13, %s1566_s29 }
  0x43   : > { %1000 = vrot.lane.b32.xlu0 %v1619_v9, %s1567_s30 }
  0x45   : > { %1002 = vrot.lane.b32.xlu1 %v246_v12, %s1567_s30 }
  0x47   : > { %1004 = vrot.lane.b32.xlu0 %v1622_v11, %s1567_s30 }
  0x49   : > { %1006 = vrot.lane.b32.xlu1 %v247_v13, %s1567_s30 }
  0x4b   : > { %1110 = vrot.lane.b32.xlu0 %v1619_v9, %s1568_s6 }
  0x4d   : > { %1112 = vrot.lane.b32.xlu1 %v246_v12, %s1568_s6 }
  0x4f   : > { %1114 = vrot.lane.b32.xlu0 %v1622_v11, %s1568_s6  ;;  %v1423_v11 = vld [vmem:[%s1770_s1 + $0x14] sm:$0xf] }
  0x51   : > { %1116 = vrot.lane.b32.xlu1 %v247_v13, %s1568_s6 }
  0x53   : > { %1221 = vperm.xlu0 %1546, %v1218_v14  }
  0x85   : > { %v249_v15 = vpop.permute.xlu0 %248 }
  0x87   : > { %v253_v16 = vpop.permute.xlu1 %252 }
  0x89   : > { %v251_v17 = vpop.permute.xlu0 %250 }
  0x8a   : > { %v258_v18 = vsel %vm256_vm1, %v251_v17, %v253_v16  ;;  %v257_v19 = vsel %vm256_vm1, %v249_v15, %v251_v17 }
  0x8b   : > { %1405 = vmatprep.subr.msk.bf16.mxu0 %vm264_vm2, %v258_v18  ;;  %v255_v20 = vpop.permute.xlu1 %254  ;;  %v266_v21 = vsel %vm264_vm2, %v257_v19, 0 }
  0x8c   : > { %275 = vmatpush1.bf16.msra.mxu0 %v266_v21  ;;  %v259_v22 = vsel %vm256_vm1, %v253_v16, %v255_v20  ;;  %v1427_v21 = vld [vmem:[%s1770_s1 + $0x18] sm:$0xf] }
  0x8d   : > { %v272_v24 = vsel %vm264_vm2, %v259_v22, 0  ;;  %v451_v25 = vpop.permute.xlu0 %450  ;;  %1408 = vmatprep.subr.msk.bf16.mxu0 %vm264_vm2, %v246_v12 }
  0x8e   : > { %1466 = vmatpush3.bf16.msra.mxu1 %v272_v24 }
  0x8f   : > { %1406 = vmatmul.mubr.msk.bf16.vlgmr.msra.gmra.mrb[0].mxu0 %vm260_vm3, %v1404_v23  ;;  %1471 = vmatprep.subr.bf16.mxu1 %v1558_v5  ;;  %v453_v27 = vpop.permute.xlu1 %452 }
  0x90   : > { %368 = vmatpush1.bf16.msra.mxu0 %v359_v26  ;;  %399 = vmatprep.mubr.bf16.mxu0 %v1559_v6  ;;  %v459_v30 = vsel %vm458_vm4, %v451_v25, %v453_v27 }
  0x91   : > { %1468 = vmatmul.mubr.msk.bf16.vlgmr.msra.gmra.mrb[0].mxu1 %vm260_vm3, %v1404_v23  ;;  %v455_v29 = vpop.permute.xlu0 %454  ;;  %v466_v35 = vsel %vm264_vm2, %v459_v30, 0 }
  0x92   : > { %v460_v31 = vsel %vm458_vm4, %v453_v27, %v455_v29  ;;  %1472 = vmatpush3.bf16.msra.mxu1 %v365_v28  ;;  %1473 = vmatprep.mubr.msk.bf16.mxu1 %vm1560_vm0, %v1558_v5 }
  0x93   : > { %1412 = vmatprep.subr.msk.bf16.mxu0 %vm264_vm2, %v460_v31  ;;  %v457_v32 = vpop.permute.xlu1 %456  ;;  %1477 = vmatprep.subr.bf16.mxu1 %v1558_v5  ;;  %v1431_v31 = vld [vmem:[%s1770_s1 + $0x1c] sm:$0xf] }
  0x94   : > { %v461_v34 = vsel %vm458_vm4, %v455_v29, %v457_v32 }
  0x95   : > { %v561_v36 = vpop.permute.xlu0 %560  ;;  %v472_v37 = vsel %vm264_vm2, %v461_v34, 0 }
  0x97   : > { %1409 = vmatmul.mubr.msk.bf16.vlgmr.msra.gmra.mrb[4].mxu0 %vm260_vm3, %v227_v33  ;;  %v563_v38 = vpop.permute.xlu1 %562 }
  0x98   : > { %475 = vmatpush1.bf16.msra.mxu0 %v466_v35  ;;  %506 = vmatprep.mubr.bf16.mxu0 %v1559_v6  ;;  %v569_v40 = vsel %vm568_vm5, %v561_v36, %v563_v38  ;;  %v1435_v35 = vld [vmem:[%s1770_s1 + $0x20] sm:$0xf] }
  0x99   : > { %1474 = vmatmul.mubr.msk.bf16.vlgmr.msra.gmra.mrb[4].mxu1 %vm260_vm3, %v227_v33  ;;  %v565_v39 = vpop.permute.xlu0 %564  ;;  %v576_v45 = vsel %vm264_vm2, %v569_v40, 0  ;;  %v1234_v36 = vld [vmem:[%s1773_s4] sm:$0xf] }
  0x9a   : > { %1478 = vmatpush3.bf16.msra.mxu1 %v472_v37  ;;  %v570_v41 = vsel %vm568_vm5, %v563_v38, %v565_v39  ;;  %1479 = vmatprep.mubr.msk.bf16.mxu1 %vm1560_vm0, %v1558_v5 }
  0x9b   : > { %1416 = vmatprep.subr.msk.bf16.mxu0 %vm264_vm2, %v570_v41  ;;  %v567_v42 = vpop.permute.xlu1 %566  ;;  %1483 = vmatprep.subr.bf16.mxu1 %v1558_v5 }
  0x9c   : > { %v571_v44 = vsel %vm568_vm5, %v565_v39, %v567_v42  ;;  %1237 = vperm.xlu1 %1547, %v1234_v36  }
  0x9d   : > { %v671_v46 = vpop.permute.xlu0 %670  ;;  %v582_v47 = vsel %vm264_vm2, %v571_v44, 0 }
  0x9f   : > { %1413 = vmatmul.mubr.msk.bf16.vlgmr.msra.gmra.mrb[8].mxu0 %vm260_vm3, %v1411_v43  ;;  %v673_v48 = vpop.permute.xlu1 %672 }
  0xa0   : > { %585 = vmatpush1.bf16.msra.mxu0 %v576_v45  ;;  %616 = vmatprep.mubr.bf16.mxu0 %v1559_v6  ;;  %v679_v50 = vsel %vm678_vm6, %v671_v46, %v673_v48 }
  0xa1   : > { %1480 = vmatmul.mubr.msk.bf16.vlgmr.msra.gmra.mrb[8].mxu1 %vm260_vm3, %v1411_v43  ;;  %v675_v49 = vpop.permute.xlu0 %674  ;;  %v686_v55 = vsel %vm264_vm2, %v679_v50, 0 }
  0xa2   : > { %1484 = vmatpush3.bf16.msra.mxu1 %v582_v47  ;;  %v680_v51 = vsel %vm678_vm6, %v673_v48, %v675_v49  ;;  %1485 = vmatprep.mubr.msk.bf16.mxu1 %vm1560_vm0, %v1558_v5 }
  0xa3   : > { %1420 = vmatprep.subr.msk.bf16.mxu0 %vm264_vm2, %v680_v51  ;;  %v677_v52 = vpop.permute.xlu1 %676  ;;  %1489 = vmatprep.subr.bf16.mxu1 %v1558_v5 }
  0xa4   : > { %v681_v54 = vsel %vm678_vm6, %v675_v49, %v677_v52 }
  0xa5   : > { %v781_v56 = vpop.permute.xlu0 %780  ;;  %v692_v57 = vsel %vm264_vm2, %v681_v54, 0 }
  0xa7   : > { %1417 = vmatmul.mubr.msk.bf16.vlgmr.msra.gmra.mrb[12].mxu0 %vm260_vm3, %v1415_v53  ;;  %v783_v58 = vpop.permute.xlu1 %782 }
  0xa8   : > { %695 = vmatpush1.bf16.msra.mxu0 %v686_v55  ;;  %726 = vmatprep.mubr.bf16.mxu0 %v1559_v6  ;;  %v789_v60 = vsel %vm788_vm7, %v781_v56, %v783_v58 }
  0xa9   : > { %1486 = vmatmul.mubr.msk.bf16.vlgmr.msra.gmra.mrb[12].mxu1 %vm260_vm3, %v1415_v53  ;;  %v785_v59 = vpop.permute.xlu0 %784  ;;  %v796_v1 = vsel %vm264_vm2, %v789_v60, 0 }
  0xaa   : > { %1490 = vmatpush3.bf16.msra.mxu1 %v692_v57  ;;  %v790_v61 = vsel %vm788_vm7, %v783_v58, %v785_v59  ;;  %1491 = vmatprep.mubr.msk.bf16.mxu1 %vm1560_vm0, %v1558_v5 }
  0xab   : > { %1424 = vmatprep.subr.msk.bf16.mxu0 %vm264_vm2, %v790_v61  ;;  %v787_v62 = vpop.permute.xlu1 %786  ;;  %1495 = vmatprep.subr.bf16.mxu1 %v1558_v5 }
  0xac   : > { %v791_v0 = vsel %vm788_vm7, %v785_v59, %v787_v62 }
  0xad   : > { %v891_v2 = vpop.permute.xlu0 %890  ;;  %v802_v3 = vsel %vm264_vm2, %v791_v0, 0 }
  0xaf   : > { %1421 = vmatmul.mubr.msk.bf16.vlgmr.msra.gmra.mrb[16].mxu0 %vm260_vm3, %v1419_v63  ;;  %v893_v4 = vpop.permute.xlu1 %892 }
  0xb0   : > { %805 = vmatpush1.bf16.msra.mxu0 %v796_v1  ;;  %836 = vmatprep.mubr.bf16.mxu0 %v1559_v6  ;;  %v899_v8 = vsel %vm898_vm8, %v891_v2, %v893_v4 }
  0xb1   : > { %1492 = vmatmul.mubr.msk.bf16.vlgmr.msra.gmra.mrb[16].mxu1 %vm260_vm3, %v1419_v63  ;;  %v895_v7 = vpop.permute.xlu0 %894  ;;  %v906_v13 = vsel %vm264_vm2, %v899_v8, 0 }
  0xb2   : > { %1496 = vmatpush3.bf16.msra.mxu1 %v802_v3  ;;  %v900_v9 = vsel %vm898_vm8, %v893_v4, %v895_v7  ;;  %1497 = vmatprep.mubr.msk.bf16.mxu1 %vm1560_vm0, %v1558_v5 }
  0xb3   : > { %1428 = vmatprep.subr.msk.bf16.mxu0 %vm264_vm2, %v900_v9  ;;  %v897_v10 = vpop.permute.xlu1 %896  ;;  %1501 = vmatprep.subr.bf16.mxu1 %v1558_v5 }
  0xb4   : > { %v901_v12 = vsel %vm898_vm8, %v895_v7, %v897_v10 }
  0xb5   : > { %v1001_v14 = vpop.permute.xlu0 %1000  ;;  %v912_v15 = vsel %vm264_vm2, %v901_v12, 0 }
  0xb7   : > { %1425 = vmatmul.mubr.msk.bf16.vlgmr.msra.gmra.mrb[20].mxu0 %vm260_vm3, %v1423_v11  ;;  %v1003_v16 = vpop.permute.xlu1 %1002 }
  0xb8   : > { %915 = vmatpush1.bf16.msra.mxu0 %v906_v13  ;;  %946 = vmatprep.mubr.bf16.mxu0 %v1559_v6  ;;  %v1009_v18 = vsel %vm1008_vm9, %v1001_v14, %v1003_v16 }
  0xb9   : > { %1498 = vmatmul.mubr.msk.bf16.vlgmr.msra.gmra.mrb[20].mxu1 %vm260_vm3, %v1423_v11  ;;  %v1005_v17 = vpop.permute.xlu0 %1004  ;;  %v1016_v23 = vsel %vm264_vm2, %v1009_v18, 0 }
  0xba   : > { %1502 = vmatpush3.bf16.msra.mxu1 %v912_v15  ;;  %v1010_v19 = vsel %vm1008_vm9, %v1003_v16, %v1005_v17  ;;  %1503 = vmatprep.mubr.msk.bf16.mxu1 %vm1560_vm0, %v1558_v5 }
  0xbb   : > { %1432 = vmatprep.subr.msk.bf16.mxu0 %vm264_vm2, %v1010_v19  ;;  %v1007_v20 = vpop.permute.xlu1 %1006  ;;  %1507 = vmatprep.subr.bf16.mxu1 %v1558_v5 }
  0xbc   : > { %v1011_v22 = vsel %vm1008_vm9, %v1005_v17, %v1007_v20 }
  0xbd   : > { %v1111_v24 = vpop.permute.xlu0 %1110  ;;  %v1022_v25 = vsel %vm264_vm2, %v1011_v22, 0 }
  0xbf   : > { %1429 = vmatmul.mubr.msk.bf16.vlgmr.msra.gmra.mrb[24].mxu0 %vm260_vm3, %v1427_v21  ;;  %v1113_v26 = vpop.permute.xlu1 %1112 }
  0xc0   : > { %1025 = vmatpush1.bf16.msra.mxu0 %v1016_v23  ;;  %1056 = vmatprep.mubr.bf16.mxu0 %v1559_v6  ;;  %v1119_v28 = vsel %vm1118_vm10, %v1111_v24, %v1113_v26 }
  0xc1   : > { %1504 = vmatmul.mubr.msk.bf16.vlgmr.msra.gmra.mrb[24].mxu1 %vm260_vm3, %v1427_v21  ;;  %v1115_v27 = vpop.permute.xlu0 %1114  ;;  %v1126_v33 = vsel %vm264_vm2, %v1119_v28, 0 }
  0xc2   : > { %1508 = vmatpush3.bf16.msra.mxu1 %v1022_v25  ;;  %v1120_v29 = vsel %vm1118_vm10, %v1113_v26, %v1115_v27  ;;  %1509 = vmatprep.mubr.msk.bf16.mxu1 %vm1560_vm0, %v1558_v5 }
  0xc3   : > { %1436 = vmatprep.subr.msk.bf16.mxu0 %vm264_vm2, %v1120_v29  ;;  %v1117_v30 = vpop.permute.xlu1 %1116  ;;  %1513 = vmatprep.subr.bf16.mxu1 %v1558_v5 }
  0xc4   : > { %v1121_v32 = vsel %vm1118_vm10, %v1115_v27, %v1117_v30 }
  0xc5   : > { %v1132_v34 = vsel %vm264_vm2, %v1121_v32, 0 }
  0xc7   : > { %1433 = vmatmul.mubr.msk.bf16.vlgmr.msra.gmra.mrb[28].mxu0 %vm260_vm3, %v1431_v31 }
  0xc8   : > { %1135 = vmatpush1.bf16.msra.mxu0 %v1126_v33  ;;  %1166 = vmatprep.mubr.bf16.mxu0 %v1559_v6 }
  0xc9   : > { %1510 = vmatmul.mubr.msk.bf16.vlgmr.msra.gmra.mrb[28].mxu1 %vm260_vm3, %v1431_v31 }
  0xca   : > { %1514 = vmatpush3.bf16.msra.mxu1 %v1132_v34  ;;  %1515 = vmatprep.mubr.msk.bf16.mxu1 %vm1560_vm0, %v1558_v5 }
  0xcb   : > { %1519 = vmatprep.subr.bf16.mxu1 %v1558_v5 }
  0xcf   : > { %1437 = vmatmul.mubr.msk.bf16.vlgmr.msra.gmra.mrb[32].mxu0 %vm260_vm3, %v1435_v35 }
  0xd0   : > { %1286 = vmatprep.mubr.bf16.mxu0 %v1559_v6 }
  0xd1   : > { %1516 = vmatmul.mubr.msk.bf16.vlgmr.msra.gmra.mrb[32].mxu1 %vm260_vm3, %v1435_v35 }
  0xd2   : > { %1521 = vmatprep.mubr.msk.bf16.mxu1 %vm1560_vm0, %v1558_v5 }
 0x162   : > { %v308_v37 = vpop.f32.mrb[0].mxu0 }
 0x163   : > { %v310_v38 = vpop.f32.mrb[1].mxu0 }
 0x164   : > { %v312_v39 = vpop.f32.mrb[2].mxu0  ;;  %v349_v40 = vpop.f32.mrb[0].mxu1 }
 0x165   : > { %v313_v41 = vpop.f32.mrb[3].mxu0  ;;  %v1469_v42 = vpop.f32.mrb[1].mxu1 }
 0x166   : > { %v352_v43 = vpop.f32.mrb[2].mxu1 }
 0x167   : > { %v1470_v44 = vpop.f32.mrb[3].mxu1 }
 0x16a   : > { %v401_v45 = vpop.f32.mrb[4].mxu0 }
 0x16b   : > { %v402_v6 = vadd.f32 %v401_v45, %v308_v37  ;;  %v403_v46 = vpop.f32.mrb[5].mxu0 }
 0x16c   : > { %v404_v47 = vadd.f32 %v403_v46, %v310_v38  ;;  %v405_v48 = vpop.f32.mrb[6].mxu0  ;;  %v442_v49 = vpop.f32.mrb[4].mxu1 }
 0x16d   : > { %v443_v5 = vadd.f32 %v442_v49, %v349_v40  ;;  %v406_v50 = vpop.f32.mrb[7].mxu0  ;;  %v1475_v51 = vpop.f32.mrb[5].mxu1 }
 0x16e   : > { %v445_v52 = vpop.f32.mrb[6].mxu1 }
 0x16f   : > { %v1476_v53 = vpop.f32.mrb[7].mxu1 }
 0x172   : > { %v508_v54 = vpop.f32.mrb[8].mxu0 }
 0x173   : > { %v555_v55 = vadd.f32 %v508_v54, %v402_v6  ;;  %v510_v56 = vpop.f32.mrb[9].mxu0 }
 0x174   : > { %v556_v57 = vadd.f32 %v510_v56, %v404_v47  ;;  %v512_v58 = vpop.f32.mrb[10].mxu0  ;;  %v549_v59 = vpop.f32.mrb[8].mxu1 }
 0x175   : > { %v557_v60 = vadd.f32 %v549_v59, %v443_v5  ;;  %v513_v61 = vpop.f32.mrb[11].mxu0  ;;  %v1481_v62 = vpop.f32.mrb[9].mxu1 }
 0x176   : > { %v552_v63 = vpop.f32.mrb[10].mxu1 }
 0x177   : > { %v1482_v0 = vpop.f32.mrb[11].mxu1 }
 0x17a   : > { %v618_v1 = vpop.f32.mrb[12].mxu0 }
 0x17b   : > { %v665_v2 = vadd.f32 %v618_v1, %v555_v55  ;;  %v620_v3 = vpop.f32.mrb[13].mxu0 }
 0x17c   : > { %v666_v4 = vadd.f32 %v620_v3, %v556_v57  ;;  %v622_v7 = vpop.f32.mrb[14].mxu0  ;;  %v659_v8 = vpop.f32.mrb[12].mxu1 }
 0x17d   : > { %v667_v9 = vadd.f32 %v659_v8, %v557_v60  ;;  %v623_v10 = vpop.f32.mrb[15].mxu0  ;;  %v1487_v11 = vpop.f32.mrb[13].mxu1 }
 0x17e   : > { %v662_v12 = vpop.f32.mrb[14].mxu1  ;;  %v1222_v57 = vpop.permute.xlu0 %1221 }
 0x17f   : > { %v1488_v13 = vpop.f32.mrb[15].mxu1 }
 0x182   : > { %v728_v14 = vpop.f32.mrb[16].mxu0 }
 0x183   : > { %v775_v15 = vadd.f32 %v728_v14, %v665_v2  ;;  %v730_v16 = vpop.f32.mrb[17].mxu0 }
 0x184   : > { %v776_v17 = vadd.f32 %v730_v16, %v666_v4  ;;  %v732_v18 = vpop.f32.mrb[18].mxu0  ;;  %v769_v19 = vpop.f32.mrb[16].mxu1 }
 0x185   : > { %v777_v20 = vadd.f32 %v769_v19, %v667_v9  ;;  %v733_v21 = vpop.f32.mrb[19].mxu0  ;;  %v1493_v22 = vpop.f32.mrb[17].mxu1 }
 0x186   : > { %v772_v23 = vpop.f32.mrb[18].mxu1  ;;  %v1238_v18 = vpop.permute.xlu1 %1237 }
 0x187   : > { %v1494_v24 = vpop.f32.mrb[19].mxu1 }
 0x18a   : > { %v838_v25 = vpop.f32.mrb[20].mxu0 }
 0x18b   : > { %v885_v26 = vadd.f32 %v838_v25, %v775_v15  ;;  %v840_v27 = vpop.f32.mrb[21].mxu0 }
 0x18c   : > { %v886_v28 = vadd.f32 %v840_v27, %v776_v17  ;;  %v842_v29 = vpop.f32.mrb[22].mxu0  ;;  %v879_v30 = vpop.f32.mrb[20].mxu1  ;;  %v1230_v17 = vld [vmem:[%s1772_s3] sm:$0x3] }
 0x18d   : > { %v887_v31 = vadd.f32 %v879_v30, %v777_v20  ;;  %v843_v32 = vpop.f32.mrb[23].mxu0  ;;  %v1499_v33 = vpop.f32.mrb[21].mxu1 }
 0x18e   : > { %v882_v34 = vpop.f32.mrb[22].mxu1 }
 0x18f   : > { %v1500_v35 = vpop.f32.mrb[23].mxu1 }
 0x192   : > { %v948_v36 = vpop.f32.mrb[24].mxu0 }
 0x193   : > { %v995_v37 = vadd.f32 %v948_v36, %v885_v26  ;;  %v950_v38 = vpop.f32.mrb[25].mxu0 }
 0x194   : > { %v996_v39 = vadd.f32 %v950_v38, %v886_v28  ;;  %v952_v40 = vpop.f32.mrb[26].mxu0  ;;  %v989_v41 = vpop.f32.mrb[24].mxu1 }
 0x195   : > { %v997_v42 = vadd.f32 %v989_v41, %v887_v31  ;;  %v953_v43 = vpop.f32.mrb[27].mxu0  ;;  %v1505_v44 = vpop.f32.mrb[25].mxu1 }
 0x196   : > { %v992_v45 = vpop.f32.mrb[26].mxu1 }
 0x197   : > { %v1506_v6 = vpop.f32.mrb[27].mxu1 }
 0x19a   : > { %v1058_v46 = vpop.f32.mrb[28].mxu0 }
 0x19b   : > { %v1105_v47 = vadd.f32 %v1058_v46, %v995_v37  ;;  %v1060_v48 = vpop.f32.mrb[29].mxu0 }
 0x19c   : > { %v1106_v49 = vadd.f32 %v1060_v48, %v996_v39  ;;  %v1062_v5 = vpop.f32.mrb[30].mxu0  ;;  %v1099_v50 = vpop.f32.mrb[28].mxu1 }
 0x19d   : > { %v1107_v51 = vadd.f32 %v1099_v50, %v997_v42  ;;  %v1063_v52 = vpop.f32.mrb[31].mxu0  ;;  %v1511_v53 = vpop.f32.mrb[29].mxu1 }
 0x19e   : > { %v1102_v54 = vpop.f32.mrb[30].mxu1 }
 0x19f   : > { %v1512_v55 = vpop.f32.mrb[31].mxu1 }
 0x1a2   : > { %v1168_v56 = vpop.f32.mrb[32].mxu0 }
 0x1a3   : > { %v1215_v58 = vadd.f32 %v1168_v56, %v1105_v47  ;;  %v1170_v59 = vpop.f32.mrb[33].mxu0 }
 0x1a4   : > { %v1216_v60 = vadd.f32 %v1170_v59, %v1106_v49  ;;  %v1172_v61 = vpop.f32.mrb[34].mxu0  ;;  %v1209_v62 = vpop.f32.mrb[32].mxu1 }
 0x1a5   : > { %v1224_v63 = vadd.f32 %v1222_v57, %v1215_v58  ;;  %v1217_v0 = vadd.f32 %v1209_v62, %v1107_v51  ;;  %v1173_v1 = vpop.f32.mrb[35].mxu0  ;;  %v1517_v2 = vpop.f32.mrb[33].mxu1 }
 0x1a6   : > { %v1225_v3 = vadd.f32 %v1222_v57, %v1216_v60  ;;  %v1212_v4 = vpop.f32.mrb[34].mxu1 }
 0x1a7   : > { %v1227_v7 = vmax.f32 %v1224_v63, 0.0  ;;  %v1226_v8 = vadd.f32 %v1222_v57, %v1217_v0  ;;  %v1518_v9 = vpop.f32.mrb[35].mxu1 }
 0x1a8   : > { %v1228_v10 = vmax.f32 %v1225_v3, 0.0 }
 0x1a9   : > { %v1231_v11 = vpack.c.bf16 %v1227_v7, %v1227_v7  ;;  %v1229_v12 = vmax.f32 %v1226_v8, 0.0 }
 0x1aa   : > { %v1232_v13 = vpack.c.bf16 %v1228_v10, %v1228_v10 }
 0x1ab   : > { %v1233_v14 = vpack.c.bf16 %v1229_v12, %v1229_v12  ;;  %v1246_v15 = vsel %vm1244_vm11, %v1231_v11, 0 }
 0x1ac   : > { %1439 = vmatprep.subr.msk.bf16.mxu0 %vm1244_vm11, %v1232_v13 }
 0x1ad   : > { %1255 = vmatpush1.bf16.msra.mxu0 %v1246_v15  ;;  %v1252_v16 = vsel %vm1244_vm11, %v1233_v14, 0 }
 0x1ae   : > { %1520 = vmatpush3.bf16.msra.mxu1 %v1252_v16 }
 0x1b0   : > { %1440 = vmatmul.mubr.msk.bf16.vlgmr.msra.gmra.mrb[36].mxu0 %vm1240_vm12, %v1230_v17 }
 0x1b1   : > { %1522 = vmatmul.mubr.msk.bf16.vlgmr.msra.gmra.mrb[36].mxu1 %vm1240_vm12, %v1230_v17 }
 0x283   : > { %v1288_v19 = vpop.f32.mrb[36].mxu0 }
 0x284   : > { %v1290_v20 = vpop.f32.mrb[37].mxu0  ;;  %v1329_v21 = vpop.f32.mrb[36].mxu1  ;;  %v1289_v22 = vadd.f32 %v1288_v19, %v1238_v18 }
 0x285   : > { %v1292_v23 = vpop.f32.mrb[38].mxu0  ;;  %v1291_v24 = vadd.f32 %v1290_v20, %v1238_v18  ;;  %v1330_v25 = vadd.f32 %v1329_v21, %v1238_v18  ;;  %v1523_v26 = vpop.f32.mrb[37].mxu1 }
 0x286   : > { %v1293_v27 = vpop.f32.mrb[39].mxu0  ;;  %v1332_v28 = vpop.f32.mrb[38].mxu1 }
 0x287   : > { %v1337_v29 = vcombine.low %v1289_v22, %v1291_v24  ;;  %1340 = vst [vmem:[%s224_s11 + $0x8] sm:$0xf] %v1330_v25  ;;  %v1524_v30 = vpop.f32.mrb[39].mxu1 }
 0x289   : > { %1339 = vst [vmem:[%s224_s11] sm:$0xff] %v1337_v29 }
 0x28a PF: > { %s15_s18 = sadd.s32 1, %s1555_s18  }
 0x28b   : > { %p12_p4 = scmp.ge.s32.totalorder %s15_s18, 4  }
 0x28d   :  { %14 = sbr.rel (!%p12_p4) target bundleno = 1 (0x1), region = 78 }

</bundles_post_ra>
